<compile_context>
chip_gen: v6e
topology: v6e:2x2x1
jax: 0.10.0
libtpu: 0.0.40
codegen_flags: <defaults>
</compile_context>

<pallas_src>
import functools

import jax
import jax.numpy as jnp
from jax.experimental import pallas as pl
from jax.experimental.pallas import tpu as pltpu


# ---------------------------------------------------------------------------
# Kernels
# ---------------------------------------------------------------------------

def _se_fused_kernel(x_ref, w1_ref, b1_ref, w2_ref, b2_ref, o_ref, *, inv_n):
    """One batch element per grid step: pool -> fc1 -> relu -> fc2 -> sigmoid -> scale."""
    x = x_ref[0].astype(jnp.float32)                                   # (C, N)

    # Global average pool over the spatial (lane) axis -> (C, 1) column.
    mean = jnp.sum(x, axis=-1, keepdims=True) * inv_n                  # (C, 1)

    # fc1 (1x1x1 conv): (Cr, C) @ (C, 1) + (Cr, 1)
    h = jnp.dot(w1_ref[...], mean, preferred_element_type=jnp.float32) + b1_ref[...]
    h = jnp.maximum(h, 0.0)
    # fc2: (C, Cr) @ (Cr, 1) + (C, 1)
    g = jnp.dot(w2_ref[...], h, preferred_element_type=jnp.float32) + b2_ref[...]
    gate = jax.nn.sigmoid(g)                                           # (C, 1)

    o_ref[0] = (x * gate).astype(o_ref.dtype)                          # broadcast over lanes


def _se_pool_gate_kernel(x_ref, w1_ref, b1_ref, w2_ref, b2_ref, gate_ref, acc_ref, *, inv_n):
    """Pass 1: accumulate per-channel sums over spatial tiles; finalize gate on last tile."""
    j = pl.program_id(1)

    @pl.when(j == 0)
    def _init():
        acc_ref[...] = jnp.zeros_like(acc_ref)

    # Partial sum of this (C, tn) tile over the lane axis (XLU reduce, HBM-bound kernel).
    acc_ref[...] += jnp.sum(x_ref[0].astype(jnp.float32), axis=-1, keepdims=True)

    @pl.when(j == pl.num_programs(1) - 1)
    def _finalize():
        mean = acc_ref[...] * inv_n                                    # (C, 1)
        h = jnp.dot(w1_ref[...], mean, preferred_element_type=jnp.float32) + b1_ref[...]
        h = jnp.maximum(h, 0.0)
        g = jnp.dot(w2_ref[...], h, preferred_element_type=jnp.float32) + b2_ref[...]
        gate_ref[0] = jax.nn.sigmoid(g).astype(gate_ref.dtype)         # (C, 1)


def _se_scale_kernel(gate_ref, x_ref, o_ref):
    """Pass 2: elementwise channel gating, lane-dense tiles."""
    gate = gate_ref[0]                                                 # (C, 1) f32
    o_ref[0] = (x_ref[0].astype(jnp.float32) * gate).astype(o_ref.dtype)


# ---------------------------------------------------------------------------
# Wrappers
# ---------------------------------------------------------------------------

def _choose_tile_n(n, max_tile):
    """Largest lane-aligned (x128) tile that evenly divides n, capped at max_tile."""
    if n <= max_tile:
        return n
    t = (max_tile // 128) * 128
    while t >= 128:
        if n % t == 0:
            return t
        t -= 128
    # No lane-aligned divisor: fall back to the full axis so the block stays legal
    # (last block dim must be a multiple of 128 or the full extent).
    return n


def _se_fused_call(x_bcn, w1, b1, w2, b2, inv_n):
    B, C, N = x_bcn.shape
    Cr = w1.shape[0]
    kernel = functools.partial(_se_fused_kernel, inv_n=inv_n)
    return pl.pallas_call(
        kernel,
        out_shape=jax.ShapeDtypeStruct((B, C, N), x_bcn.dtype),
        grid_spec=pltpu.PrefetchScalarGridSpec(
            num_scalar_prefetch=0,
            grid=(B,),
            in_specs=[
                pl.BlockSpec((1, C, N), lambda b: (b, 0, 0)),   # x slab (one batch)
                pl.BlockSpec((Cr, C), lambda b: (0, 0)),        # W1
                pl.BlockSpec((Cr, 1), lambda b: (0, 0)),        # b1
                pl.BlockSpec((C, Cr), lambda b: (0, 0)),        # W2
                pl.BlockSpec((C, 1), lambda b: (0, 0)),         # b2
            ],
            out_specs=pl.BlockSpec((1, C, N), lambda b: (b, 0, 0)),
        ),
        compiler_params=pltpu.CompilerParams(dimension_semantics=("parallel",)),
    )(x_bcn, w1, b1, w2, b2)


def _se_tiled_call(x_bcn, w1, b1, w2, b2, inv_n, max_tile_n):
    B, C, N = x_bcn.shape
    Cr = w1.shape[0]
    tn = _choose_tile_n(N, max_tile_n)
    nj = N // tn

    # Pass 1: global average pool + gate (grid reduction over spatial tiles, axis last).
    pool_kernel = functools.partial(_se_pool_gate_kernel, inv_n=inv_n)
    gate = pl.pallas_call(
        pool_kernel,
        out_shape=jax.ShapeDtypeStruct((B, C, 1), jnp.float32),
        grid_spec=pltpu.PrefetchScalarGridSpec(
            num_scalar_prefetch=0,
            grid=(B, nj),
            in_specs=[
                pl.BlockSpec((1, C, tn), lambda b, j: (b, 0, j)),   # x tile
                pl.BlockSpec((Cr, C), lambda b, j: (0, 0)),
                pl.BlockSpec((Cr, 1), lambda b, j: (0, 0)),
                pl.BlockSpec((C, Cr), lambda b, j: (0, 0)),
                pl.BlockSpec((C, 1), lambda b, j: (0, 0)),
            ],
            out_specs=pl.BlockSpec((1, C, 1), lambda b, j: (b, 0, 0)),  # resident, written at last j
            scratch_shapes=[pltpu.VMEM((C, 1), jnp.float32)],
        ),
        compiler_params=pltpu.CompilerParams(
            dimension_semantics=("parallel", "arbitrary")),
    )(x_bcn, w1, b1, w2, b2)

    # Pass 2: channel-wise gating (fully parallel, lane-dense output stores).
    y = pl.pallas_call(
        _se_scale_kernel,
        out_shape=jax.ShapeDtypeStruct((B, C, N), x_bcn.dtype),
        grid_spec=pltpu.PrefetchScalarGridSpec(
            num_scalar_prefetch=0,
            grid=(B, nj),
            in_specs=[
                pl.BlockSpec((1, C, 1), lambda b, j: (b, 0, 0)),    # gate
                pl.BlockSpec((1, C, tn), lambda b, j: (b, 0, j)),   # x tile
            ],
            out_specs=pl.BlockSpec((1, C, tn), lambda b, j: (b, 0, j)),
        ),
        compiler_params=pltpu.CompilerParams(
            dimension_semantics=("parallel", "parallel")),
    )(gate, x_bcn)
    return y


def se_block(x_ncdhw, params, *, force_tiled=False, tile_budget_bytes=2 * 1024 * 1024):
    """SEBlock forward. x_ncdhw: (B, C, D, H, W). Returns same shape."""
    B, C, D, H, W = x_ncdhw.shape
    N = D * H * W
    Cr = params["w1"].shape[0]

    x_bcn = x_ncdhw.reshape(B, C, N)                       # free: collapses trailing dims
    w1 = params["w1"].astype(jnp.float32)                  # (Cr, C)
    w2 = params["w2"].astype(jnp.float32)                  # (C, Cr)
    b1 = params["b1"].reshape(Cr, 1).astype(jnp.float32)
    b2 = params["b2"].reshape(C, 1).astype(jnp.float32)
    inv_n = 1.0 / float(N)

    slab_bytes = C * N * 4
    if (not force_tiled) and slab_bytes <= 3 * 1024 * 1024:
        # Whole per-batch slab (double-buffered in + out) fits default scoped VMEM
        # on v5e/v6e/v7x -> single pass: x read once, written once.
        y_bcn = _se_fused_call(x_bcn, w1, b1, w2, b2, inv_n)
    else:
        # Large volumes: tile the spatial axis under a VMEM byte budget.
        max_tile_n = max(128, (tile_budget_bytes // (C * 4) // 128) * 128)
        y_bcn = _se_tiled_call(x_bcn, w1, b1, w2, b2, inv_n, max_tile_n)

    return y_bcn.reshape(B, C, D, H, W)


# ---------------------------------------------------------------------------
# Pure-JAX reference & params
# ---------------------------------------------------------------------------

def _reference(x, params):
    """Mirrors the PyTorch SEBlock.forward."""
    mean = jnp.mean(x, axis=(2, 3, 4), keepdims=True)                        # (B, C, 1, 1, 1)
    h = jnp.einsum("oc,bcxyz->boxyz", params["w1"], mean)
    h = h + params["b1"][None, :, None, None, None]
    h = jnp.maximum(h, 0.0)
    g = jnp.einsum("oc,bcxyz->boxyz", params["w2"], h)
    g = g + params["b2"][None, :, None, None, None]
    gate = jax.nn.sigmoid(g)
    return x * gate


def make_params(channels, reduction, key):
    """Shapes/init match nn.Conv3d(channels, reduced, 1) / nn.Conv3d(reduced, channels, 1);
    fc2 bias is constant 0.1 as in the module's __init__."""
    cr = max(channels // reduction, 1)
    k1, k2, k3 = jax.random.split(key, 3)
    s1 = 1.0 / jnp.sqrt(channels)
    s2 = 1.0 / jnp.sqrt(cr)
    return {
        "w1": jax.random.uniform(k1, (cr, channels), jnp.float32, -s1, s1),
        "b1": jax.random.uniform(k2, (cr,), jnp.float32, -s1, s1),
        "w2": jax.random.uniform(k3, (channels, cr), jnp.float32, -s2, s2),
        "b2": jnp.full((channels,), 0.1, jnp.float32),
    }


if __name__ == "__main__":
    key = jax.random.PRNGKey(0)
    k_x, k_p = jax.random.split(key)

    B, C, D, H, W = 2, 16, 8, 8, 8            # N = 512 voxels per batch element
    reduction = 8
    x = jax.random.normal(k_x, (B, C, D, H, W), jnp.float32)
    params = make_params(C, reduction, k_p)

    y_ref = _reference(x, params)

    # Fused single-pass path (what small volumes take).
    y_fused = jax.block_until_ready(se_block(x, params))
    assert y_fused.shape == x.shape
    assert jnp.allclose(y_fused, y_ref, atol=1e-5, rtol=1e-4), (
        f"fused max abs err {jnp.max(jnp.abs(y_fused - y_ref))}")

    # Tiled two-pass path, forced with small tiles so the grid reduction is exercised.
    y_tiled = jax.block_until_ready(
        se_block(x, params, force_tiled=True, tile_budget_bytes=8 * 1024))
    assert jnp.allclose(y_tiled, y_ref, atol=1e-5, rtol=1e-4), (
        f"tiled max abs err {jnp.max(jnp.abs(y_tiled - y_ref))}")

    print("KERNEL_OK")
</pallas_src>

<mosaic_0001>
module attributes {stable_mosaic.version = 11 : i64} {
  func.func @_se_fused_kernel(%arg0: i32, %arg1: memref<1x16x512xf32, #tpu.memory_space<vmem>>, %arg2: memref<2x16xf32, #tpu.memory_space<vmem>>, %arg3: memref<2x1xf32, #tpu.memory_space<vmem>>, %arg4: memref<16x2xf32, #tpu.memory_space<vmem>>, %arg5: memref<16x1xf32, #tpu.memory_space<vmem>>, %arg6: memref<1x16x512xf32, #tpu.memory_space<vmem>>) attributes {dimension_semantics = [#tpu.dimension_semantics<parallel>], iteration_bounds = array<i64: 2>, scalar_prefetch = 0 : i64, scratch_operands = 0 : i64, tpu.core_type = #tpu.core_type<tc>, window_params = [{transform_indices = @transform_0, window_bounds = array<i64: 1, 16, 512>}, {pipeline_mode = #tpu.pipeline_mode<synchronous>, transform_indices = @transform_1, window_bounds = array<i64: 2, 16>}, {pipeline_mode = #tpu.pipeline_mode<synchronous>, transform_indices = @transform_2, window_bounds = array<i64: 2, 1>}, {pipeline_mode = #tpu.pipeline_mode<synchronous>, transform_indices = @transform_3, window_bounds = array<i64: 16, 2>}, {pipeline_mode = #tpu.pipeline_mode<synchronous>, transform_indices = @transform_4, window_bounds = array<i64: 16, 1>}, {transform_indices = @transform_5, window_bounds = array<i64: 1, 16, 512>}]} {
    %c0 = arith.constant 0 : index
    %c0_0 = arith.constant 0 : index
    %c0_1 = arith.constant 0 : index
    %0 = vector.load %arg1[%c0, %c0_0, %c0_1] : memref<1x16x512xf32, #tpu.memory_space<vmem>>, vector<1x16x512xf32>
    %1 = vector.shape_cast %0 : vector<1x16x512xf32> to vector<16x512xf32>
    %cst = arith.constant dense<0.000000e+00> : vector<16xf32>
    %2 = vector.multi_reduction <add>, %1, %cst [1] : vector<16x512xf32> to vector<16xf32>
    %3 = vector.shape_cast %2 : vector<16xf32> to vector<16x1xf32>
    %cst_2 = arith.constant 0.001953125 : f32
    %4 = vector.broadcast %cst_2 : f32 to vector<16x1xf32>
    %5 = arith.mulf %3, %4 : vector<16x1xf32>
    %c0_3 = arith.constant 0 : index
    %c0_4 = arith.constant 0 : index
    %6 = vector.load %arg2[%c0_3, %c0_4] : memref<2x16xf32, #tpu.memory_space<vmem>>, vector<2x16xf32>
    %cst_5 = arith.constant dense<0.000000e+00> : vector<2x1xf32>
    %7 = tpu.matmul %6, %5, %cst_5 {dimension_numbers = #tpu.dot_dimension_numbers<[1], [0], [0], [1], [0, 0, 1, 1], [], []>} : vector<2x16xf32>, vector<16x1xf32>, vector<2x1xf32> -> vector<2x1xf32>
    %c0_6 = arith.constant 0 : index
    %c0_7 = arith.constant 0 : index
    %8 = vector.load %arg3[%c0_6, %c0_7] : memref<2x1xf32, #tpu.memory_space<vmem>>, vector<2x1xf32>
    %9 = arith.addf %7, %8 : vector<2x1xf32>
    %cst_8 = arith.constant 0.000000e+00 : f32
    %10 = vector.broadcast %cst_8 : f32 to vector<2x1xf32>
    %11 = arith.maximumf %9, %10 : vector<2x1xf32>
    %c0_9 = arith.constant 0 : index
    %c0_10 = arith.constant 0 : index
    %12 = vector.load %arg4[%c0_9, %c0_10] : memref<16x2xf32, #tpu.memory_space<vmem>>, vector<16x2xf32>
    %cst_11 = arith.constant dense<0.000000e+00> : vector<16x1xf32>
    %13 = tpu.matmul %12, %11, %cst_11 {dimension_numbers = #tpu.dot_dimension_numbers<[1], [0], [0], [1], [0, 0, 1, 1], [], []>} : vector<16x2xf32>, vector<2x1xf32>, vector<16x1xf32> -> vector<16x1xf32>
    %c0_12 = arith.constant 0 : index
    %c0_13 = arith.constant 0 : index
    %14 = vector.load %arg5[%c0_12, %c0_13] : memref<16x1xf32, #tpu.memory_space<vmem>>, vector<16x1xf32>
    %15 = arith.addf %13, %14 : vector<16x1xf32>
    %16 = arith.negf %15 : vector<16x1xf32>
    %17 = math.exp %16 : vector<16x1xf32>
    %cst_14 = arith.constant 1.000000e+00 : f32
    %18 = vector.broadcast %cst_14 : f32 to vector<16x1xf32>
    %19 = arith.addf %18, %17 : vector<16x1xf32>
    %20 = arith.divf %18, %19 : vector<16x1xf32>
    %21 = vector.broadcast %20 : vector<16x1xf32> to vector<16x512xf32>
    %22 = arith.mulf %1, %21 : vector<16x512xf32>
    %c0_15 = arith.constant 0 : index
    %c0_16 = arith.constant 0 : index
    %c0_17 = arith.constant 0 : index
    %23 = vector.load %arg6[%c0_15, %c0_16, %c0_17] : memref<1x16x512xf32, #tpu.memory_space<vmem>>, vector<1x16x512xf32>
    %24 = vector.shape_cast %23 : vector<1x16x512xf32> to vector<16x512xf32>
    %25 = vector.shape_cast %22 : vector<16x512xf32> to vector<1x16x512xf32>
    tpu.vector_store %arg6[%c0_15, %c0_16, %c0_17], %25 {strides = array<i32>} : memref<1x16x512xf32, #tpu.memory_space<vmem>>, vector<1x16x512xf32>,
    return
  }
  func.func @transform_0(%arg0: i32) -> (i32, i32, i32) {
    %c0_i32 = arith.constant 0 : i32
    %c0_i32_0 = arith.constant 0 : i32
    %c0_i32_1 = arith.constant 0 : i32
    return %arg0, %c0_i32, %c0_i32_0 : i32, i32, i32
  }
  func.func @transform_1(%arg0: i32) -> (i32, i32) {
    %c0_i32 = arith.constant 0 : i32
    %c0_i32_0 = arith.constant 0 : i32
    %c0_i32_1 = arith.constant 0 : i32
    return %c0_i32, %c0_i32_0 : i32, i32
  }
  func.func @transform_2(%arg0: i32) -> (i32, i32) {
    %c0_i32 = arith.constant 0 : i32
    %c0_i32_0 = arith.constant 0 : i32
    %c0_i32_1 = arith.constant 0 : i32
    return %c0_i32, %c0_i32_0 : i32, i32
  }
  func.func @transform_3(%arg0: i32) -> (i32, i32) {
    %c0_i32 = arith.constant 0 : i32
    %c0_i32_0 = arith.constant 0 : i32
    %c0_i32_1 = arith.constant 0 : i32
    return %c0_i32, %c0_i32_0 : i32, i32
  }
  func.func @transform_4(%arg0: i32) -> (i32, i32) {
    %c0_i32 = arith.constant 0 : i32
    %c0_i32_0 = arith.constant 0 : i32
    %c0_i32_1 = arith.constant 0 : i32
    return %c0_i32, %c0_i32_0 : i32, i32
  }
  func.func @transform_5(%arg0: i32) -> (i32, i32, i32) {
    %c0_i32 = arith.constant 0 : i32
    %c0_i32_0 = arith.constant 0 : i32
    %c0_i32_1 = arith.constant 0 : i32
    return %arg0, %c0_i32, %c0_i32_0 : i32, i32, i32
  }
}

</mosaic_0001>

<bundles_post_ra>
// kernel: tpu_custom_call.1
= control target key start
LH: loop header
LB: loop body
LE: loop exit
PB: predicated region body
PF: predicated region fallthrough
CT: control target
= control target key end

     0   :  { %10 = vsyncpa [#allocation3], 0  ;;  %s991_s0 = inlined_call_operand.hbm [shape: f32[2,16,512], index: 0, kind: input, shape index: {}]   ;;  %s992_s1 = inlined_call_operand.vmem [shape: f32[2,16], index: 1, kind: input, shape index: {}]   ;;  %s993_s2 = inlined_call_operand.vmem [shape: f32[2,1], index: 2, kind: input, shape index: {}]   ;;  %s994_s3 = inlined_call_operand.vmem [shape: f32[16,2], index: 3, kind: input, shape index: {}]   ;;  %s995_s4 = inlined_call_operand.vmem [shape: f32[16,1], index: 4, kind: input, shape index: {}]   ;;  %s996_s5 = inlined_call_operand.hbm [shape: f32[2,16,512], index: 5, kind: output, shape index: {}]  }
   0x1   :  { %12 = vsyncpa [#allocation3 + $0x1], 0 }
   0x2   :  { %13 = vsyncpa [#allocation4], 0 }
   0x3   :  { %15 = vsyncpa [#allocation4 + $0x1], 0  ;;  %s791_s18 = smov 0   ;;  %s793_s19 = smov 0  }
   0x4   :  { %s795_s20 = smov 0   ;;  %s797_s21 = smov 0  }
   0x5 LB: > { %s812_s22 = sadd.s32 4294967295, %s750_s21   ;;  %s555_s23 = sadd.s32 4294967294, %s750_s21   ;;  %s750_s21 = sphi %s797_s21, %s1011_s21   ;;  %s746_s20 = sphi %s795_s20, %s1010_s20   ;;  %s742_s19 = sphi %s793_s19, %s1009_s19   ;;  %s738_s18 = sphi %s791_s18, %s1008_s18  }
   0x6   : > { %s816_s24 = sadd.s32 1, %s750_s21   ;;  %s28_s25 = sadd.s32 1, %s746_s20 }
   0x7   : > { %s25_s26 = ssub.s32 %s750_s21, %s816_s24  ;;  %p35_p0 = scmp.ne.s32.totalorder %s746_s20, %s742_s19 }
   0x8   : > { %p26_p1 = scmp.eq.s32.totalorder %s25_s26, 0  ;;  %p36_p2 = scmp.eq.s32.totalorder %s750_s21, 0 }
   0x9   : > { %p41_p3 = scmp.ne.s32.totalorder %s742_s19, %s738_s18  ;;  %p42_p4 = scmp.eq.s32.totalorder %s812_s22, 0 }
   0xa   : > { %s828_s27 = scalar_select %p26_p1, %s746_s20, %s28_s25  }
   0xb   : > { %p830_p5 = por %p36_p2, %p35_p0  ;;  %p834_p6 = por %p42_p4, %p41_p3 }
   0xc   : > { %p149_p7 = scmp.eq.s32.totalorder %s812_s22, 1  ;;  %p155_p8 = scmp.eq.s32.totalorder %s555_s23, 1 }
   0xd   : > { %s1000_s29 = scalar_select %p834_p6, 1, 0 }
   0xe   : > { %p607_p10 = scmp.lt.s32.totalorder %s750_s21, 2  ;;  %p841_p11 = por %p149_p7, %p35_p0 }
   0xf   : > { %p845_p12 = por %p155_p8, %p41_p3  ;;  %s187_s7 = sand.u32 1, %s746_s20  }
  0x10   : > { %s1001_s30 = scalar_select %p841_p11, 1, 0 }
  0x11   : > { %s1002_s6 = scalar_select %p845_p12, 1, 0 }
  0x12   : > { %s575_s8 = sshll.u32 %s750_s21, 10  ;;  %s558_s9 = sshll.u32 %s187_s7, 6 }
  0x13   : > { %s854_s12 = scalar_lea.hbm %s991_s0, %s575_s8  ;;  %s191_s13 = scalar_lea.vmem [#allocation2], %s558_s9 }
  0x14   : > { %s198_s14 = sshll.u32 %s191_s13, 4  ;;  %p858_p13 = pnand %p607_p10, %p830_p5  ;;  %s862_s14 = int_to_ptr.vmem [resolvable:$true] %s198_s14 }
  0x15   : > { %s864_s16 = scalar_lea.sflag [#allocation3], %s187_s7  ;;  %s658_s17 = scalar_lea.hbm %s854_s12, 1024 }
  0x16   : > { %p659_p0 = scmp.ne.s32.totalorder %s854_s12, %s658_s17  ;;  %p660_p1 = pneg %p858_p13 }
  0x17   : > { %s663_s26 = scalar_lea.hbm %s991_s0, 2048  ;;  %p664_p4 = scmp.lt.s32.totalorder %s854_s12, %s991_s0 }
  0x18   : > { %p661_p2 = pnand %p660_p1, %p659_p0  ;;  %p665_p5 = scmp.lt.s32.totalorder %s663_s26, %s658_s17 }
  0x1a   : > { %p662_p3 = pneg %p661_p2  ;;  %p666_p7 = por %p665_p5, %p664_p4 }
  0x1c   : > { %p667_p8 = pnand %p666_p7, %p662_p3 }
  0x1e   : > { %670 = shalt.err (!%p667_p8)
}
  0x1f   : > { %s671_s7 = scalar_lea.vmem %s862_s14, 1024  ;;  %s752_s9 = smov [#allocation2]  }
  0x20   : > { %p672_p10 = scmp.ne.s32.totalorder %s862_s14, %s671_s7  ;;  %s676_s10 = sshll.u32 %s752_s9, 4  ;;  %s677_s10 = int_to_ptr.vmem [resolvable:$false] %s676_s10 }
  0x21   : > { %s678_s11 = scalar_lea.vmem %s677_s10, 2048  ;;  %p679_p2 = scmp.lt.s32.totalorder %s862_s14, %s677_s10 }
  0x22   : > { %p674_p9 = pnand %p672_p10, %p660_p1  ;;  %p680_p12 = scmp.lt.s32.totalorder %s678_s11, %s671_s7 }
  0x24   : > { %p675_p0 = pneg %p674_p9  ;;  %p681_p11 = por %p680_p12, %p679_p2 }
  0x26   : > { %p682_p6 = pnand %p681_p11, %p675_p0 }
  0x28   : > { %685 = shalt.err (!%p682_p6)
}
  0x29   : > { %s753_s13 = smov 512   ;;  %s754_s17 = smov 32  }
  0x2a   : > { %602 = dma.hbm_to_vmem [thread:$0]  (!%p858_p13), %s854_s12, 1024, %s862_s14, %s864_s16, %s753_s13, %s753_s13, %s754_s17  }
  0x2b   : > { %p561_p9 = scmp.ge.s32.totalorder %s750_s21, 1  ;;  %p206_p1 = scmp.lt.s32.totalorder %s750_s21, 3 }
  0x2d   : > { %p207_p3 = pnand %p561_p9, %p206_p1 }
  0x2e   : > { %s888_s23 = sand.u32 (!%p207_p3), 1, %s742_s19   ;;  %p1004_p6 = scmp.ne.s32.totalorder (!%p207_p3), %s1000_s29, 0 }
  0x2f   : > { %210 = sbr.rel (%p207_p3) target bundleno = 778 (0x30a), region = 40  ;;  %s562_s25 = sshll.u32 (!%p207_p3), %s888_s23, 6 }
  0x30   : > { %s213_s26 = scalar_lea.sflag (!%p207_p3), [#allocation3], %s888_s23  ;;  %s216_s28 = scalar_lea.vmem (!%p207_p3), [#allocation2], %s562_s25 }
  0x34   : > { %729 = dma.done.wait (%p1004_p6), %s213_s26, 1024  }
  0x35   : > { %731 = vsyncadd (%p1004_p6), %s213_s26, 4294966272  ;;  %v898_v0 = vld [vmem:[%s216_s28 + $0x20] sm:$0xff]  ;;  %v900_v1 = vld [vmem:[%s216_s28 + $0x28] sm:$0xff]  ;;  %v755_v14 = vmov 0.0   ;;  %vm756_vm0 = vmmov 0   ;;  %vm265_vm1 = vcmask 130048  }
  0x36   : > { %v902_v2 = vld [vmem:[%s216_s28 + $0x30] sm:$0xff]  ;;  %v256_v3 = vadd.f32 %v900_v1, %v898_v0  ;;  %v906_v4 = vld [vmem:[%s216_s28] sm:$0xff]  ;;  %v908_v5 = vld [vmem:[%s216_s28 + $0x8] sm:$0xff]  ;;  %583 = vmatprep.subr.mxu0 %v755_v14  ;;  %587 = vmatprep.mubr.msk.f32.mxu0 %vm756_vm0, %v755_v14  ;;  %vm344_vm2 = vcmask 15360   ;;  %vm351_vm3 = vcmask 1041408   ;;  %v757_v27 = vmov 0  }
  0x37   : > { %v910_v6 = vld [vmem:[%s216_s28 + $0x38] sm:$0xff]  ;;  %v245_v7 = vld [vmem:[%s216_s28 + $0x10] sm:$0xff]  ;;  %v251_v8 = vadd.f32 %v908_v5, %v906_v4  ;;  %v263_v19 = vld [vmem:[%s992_s1] sm:$0x3]  ;;  %648 = vset.pattern.permute.xlu1 %v757_v27  ;;  %649 = vset.pattern.permute.xlu0 %v757_v27  ;;  %s576_s26 = sshll.u32 %s812_s22, 10  ;;  %s469_s22 = scalar_lea.sflag [#allocation4], %s888_s23 }
  0x38   : > { %v257_v9 = vadd.f32 %v256_v3, %v902_v2  ;;  %v246_v10 = vld [vmem:[%s216_s28 + $0x18] sm:$0xff]  ;;  %v340_v20 = vld [vmem:[%s994_s3] sm:$0xff]  ;;  %v341_v26 = vld [vmem:[%s994_s3 + $0x8] sm:$0xff]  ;;  %s242_s28 = scalar_lea.vmem [#allocation5], %s562_s25  ;;  %s942_s15 = scalar_lea.hbm %s996_s5, %s576_s26 }
  0x39   : > { %v252_v11 = vadd.f32 %v251_v8, %v245_v7  ;;  %592 = vmatprep.mubr.msk.f32.mxu1 %vm344_vm2, %v340_v20  ;;  %v264_v21 = vld [vmem:[%s993_s2] sm:$0x3]  ;;  %v343_v28 = vld [vmem:[%s995_s4 + $0x8] sm:$0xff]  ;;  %s482_s29 = sshll.u32 %s242_s28, 4  ;;  %p1005_p12 = scmp.ne.s32.totalorder %s1001_s30, 0  ;;  %s944_s29 = int_to_ptr.vmem [resolvable:$true] %s482_s29 }
  0x3a   : > { %v258_v12 = vadd.f32 %v257_v9, %v910_v6  ;;  %v342_v30 = vld [vmem:[%s995_s4] sm:$0xff]  ;;  %s686_s25 = scalar_lea.vmem %s944_s29, 1024  ;;  %s758_s16 = smov [#allocation5]  }
  0x3b   : > { %v253_v13 = vadd.f32 %v252_v11, %v246_v10  ;;  %p687_p11 = scmp.ne.s32.totalorder %s944_s29, %s686_s25  ;;  %s690_s8 = sshll.u32 %s758_s16, 4  ;;  %s691_s8 = int_to_ptr.vmem [resolvable:$false] %s690_s8 }
  0x3c   : > { %259 = vadd.xlane.f32.xlu0 %v258_v12  ;;  %s692_s7 = scalar_lea.vmem %s691_s8, 2048  ;;  %p693_p5 = scmp.lt.s32.totalorder %s944_s29, %s691_s8 }
  0x3d   : > { %p688_p13 = pnand %p687_p11, %p1005_p12  ;;  %p694_p7 = scmp.lt.s32.totalorder %s692_s7, %s686_s25 }
  0x3f   : > { %p689_p4 = pneg %p688_p13  ;;  %p695_p8 = por %p694_p7, %p693_p5 }
  0x40   : > { %254 = vadd.xlane.f32.xlu0 %v253_v13 }
  0x41   : > { %p696_p10 = pnand %p695_p8, %p689_p4 }
  0xc5   : > { %v260_v15 = vpop.xlane.xlu0 %259 }
  0xc6   : > { %v262_v16 = vmul.f32 0.001953125, %v260_v15 }
  0xc8   : > { %584 = vmatpush3.msra.mxu0 %v262_v16 }
  0xc9   : > { %v255_v17 = vpop.xlane.xlu0 %254  ;;  %585 = vmatprep.subr.mxu0 %v755_v14 }
  0xca   : > { %v261_v18 = vmul.f32 0.001953125, %v255_v17 }
  0xcc   : > { %586 = vmatpush3.msra.mxu0 %v261_v18 }
  0xcd   : > { %588 = vmatmul.mubr.msk.f32.vlgmr.msra.gmra.mxu0 %vm265_vm1, %v263_v19 }
 0x18d   : > { %v335_v22 = vpop.f32.mrf.mxu0 }
 0x18e   : > { %v336_v23 = vadd.f32 %v335_v22, %v264_v21 }
 0x18f   : > { %v589_v24 = vpop.f32.mrf.mxu0 }
 0x190   : > { %v339_v25 = vmax.f32 %v336_v23, 0.0 }
 0x192   : > { %590 = vmatprep.subr.msk.mxu1 %vm351_vm3, %v339_v25 }
 0x193   : > { %591 = vmatpush3.msk.msra.mxu1 %vm351_vm3, %v339_v25 }
 0x194   : > { %593 = vmatmul.mubr.msk.f32.vlgmr.msra.gmra.mxu1 %vm344_vm2, %v341_v26 }
 0x254   : > { %v594_v29 = vpop.f32.mrf.mxu1 }
 0x255   : > { %v427_v31 = vadd.f32 %v594_v29, %v343_v28 }
 0x256   : > { %v421_v32 = vpop.f32.mrf.mxu1 }
 0x257   : > { %v569_v33 = vmul.f32 -1.442695, %v427_v31  ;;  %v422_v34 = vadd.f32 %v421_v32, %v342_v30 }
 0x259   : > { %v568_v35 = vmul.f32 -1.442695, %v422_v34  ;;  %650 = vpow2.f32 %v569_v33 }
 0x25b   : > { %652 = vpow2.f32 %v568_v35 }
 0x266   : > { %v651_v36 = vpop.eup %650 }
 0x267   : > { %v437_v39 = vadd.f32 1.0, %v651_v36 }
 0x268   : > { %v653_v37 = vpop.eup %652 }
 0x269   : > { %v436_v38 = vadd.f32 1.0, %v653_v37 }
 0x26b   : > { %654 = vrcp.f32 %v436_v38 }
 0x26c   : > { %656 = vrcp.f32 %v437_v39 }
 0x278   : > { %v655_v40 = vpop.eup %654 }
 0x279   : > { %444 = vperm.xlu1 %648, %v655_v40   ;;  %v657_v41 = vpop.eup %656 }
 0x27d   : > { %449 = vperm.xlu1 %648, %v657_v41  }
 0x2f4   : > { %v445_v42 = vpop.permute.xlu1 %444 }
 0x2f5   : > { %v452_v43 = vmul.f32 %v445_v42, %v906_v4  ;;  %v453_v44 = vmul.f32 %v445_v42, %v908_v5  ;;  %v454_v45 = vmul.f32 %v445_v42, %v245_v7  ;;  %v455_v46 = vmul.f32 %v445_v42, %v246_v10 }
 0x2f7   : > { %460 = vst [vmem:[%s242_s28] sm:$0xff] %v452_v43  ;;  %461 = vst [vmem:[%s242_s28 + $0x8] sm:$0xff] %v453_v44 }
 0x2f8   : > { %462 = vst [vmem:[%s242_s28 + $0x10] sm:$0xff] %v454_v45  ;;  %463 = vst [vmem:[%s242_s28 + $0x18] sm:$0xff] %v455_v46  ;;  %v450_v47 = vpop.permute.xlu1 %449 }
 0x2f9   : > { %v456_v48 = vmul.f32 %v450_v47, %v898_v0  ;;  %v457_v49 = vmul.f32 %v450_v47, %v900_v1  ;;  %v458_v50 = vmul.f32 %v450_v47, %v902_v2  ;;  %v459_v51 = vmul.f32 %v450_v47, %v910_v6 }
 0x2fb   : > { %464 = vst [vmem:[%s242_s28 + $0x20] sm:$0xff] %v456_v48  ;;  %465 = vst [vmem:[%s242_s28 + $0x28] sm:$0xff] %v457_v49 }
 0x2fc   : > { %466 = vst [vmem:[%s242_s28 + $0x30] sm:$0xff] %v458_v50  ;;  %467 = vst [vmem:[%s242_s28 + $0x38] sm:$0xff] %v459_v51 }
 0x2fd   : > { %699 = shalt.err (!%p696_p10)
}
 0x2fe   : > { %s700_s9 = scalar_lea.hbm %s942_s15, 1024  ;;  %s704_s13 = scalar_lea.hbm %s996_s5, 2048 }
 0x2ff   : > { %p701_p0 = scmp.ne.s32.totalorder %s942_s15, %s700_s9  ;;  %p705_p1 = scmp.lt.s32.totalorder %s942_s15, %s996_s5 }
 0x300   : > { %p706_p3 = scmp.lt.s32.totalorder %s704_s13, %s700_s9 }
 0x301   : > { %p702_p2 = pnand %p701_p0, %p1005_p12 }
 0x302   : > { %p707_p6 = por %p706_p3, %p705_p1 }
 0x303   : > { %p703_p9 = pneg %p702_p2 }
 0x305   : > { %p708_p11 = pnand %p707_p6, %p703_p9 }
 0x307   : > { %711 = shalt.err (!%p708_p11)
}
 0x308   : > { %s759_s28 = smov 512   ;;  %s760_s12 = smov 32  }
 0x309   : > { %597 = dma.vmem_to_hbm [thread:$0]  (%p1005_p12), %s944_s29, 1024, %s942_s15, %s469_s22, %s759_s28, %s759_s28, %s760_s12  }
 0x30a PF: > { %s497_s14 = sand.u32 1, %s738_s18   ;;  %p1006_p13 = scmp.ne.s32.totalorder %s1002_s6, 0 }
 0x30b   : > { %p1007_p4 = scmp.ge.s32.totalorder %s750_s21, 2  ;;  %s498_s25 = scalar_lea.sflag [#allocation4], %s497_s14 }
 0x30d   : > { %p604_p5 = pnand %p1007_p4, %p1006_p13 }
 0x30f   : > { %p605_p7 = pneg %p604_p5 }
 0x311   : > { %733 = dma.done.wait (%p605_p7), %s498_s25, 1024  }
 0x312   : > { %735 = vsyncadd (%p605_p7), %s498_s25, 4294966272  ;;  %p18_p8 = scmp.ge.s32.totalorder %s816_s24, 4   ;;  %s1008_s18 = smov %s742_s19 }
 0x313   : > { %s1009_s19 = smov %s746_s20  ;;  %s1010_s20 = smov %s828_s27 }
 0x314   : > { %s1011_s21 = smov %s816_s24  ;;  %20 = sbr.rel (!%p18_p8) target bundleno = 5 (0x5), region = 85 }
 0x319   :  { %503 = vsyncpa [#allocation3], 1 }
 0x31a   :  { %505 = vsyncpa [#allocation3 + $0x1], 1 }
 0x31b   :  { %506 = vsyncpa [#allocation4], 1 }
 0x31c   :  { %508 = vsyncpa [#allocation4 + $0x1], 1 }

</bundles_post_ra>
